<compile_context>
chip_gen: v7x
topology: tpu7x:2x2x1
jax: 0.10.0
libtpu: 0.0.40
codegen_flags: <defaults>
</compile_context>

<pallas_src>
import functools
import math

import jax
import jax.numpy as jnp
from jax.experimental import pallas as pl
from jax.experimental.pallas import tpu as pltpu


def _round_up(x, m):
    return ((x + m - 1) // m) * m


# ----------------------------- Pallas kernel --------------------------------

def _mlp_fused_kernel(*refs, n_layers, f_out_valid, eps, has_layernorm):
    """Fused (Linear -> ReLU) x (L-1) -> Linear [-> LayerNorm] on one row tile.

    refs = (x_ref, w0, b0, w1, b1, ..., [gamma, beta], o_ref)
      x   : [tm, f_in_pad]   (f32)
      w_i : [f_prev_pad, f_next_pad]  (bf16, zero-padded)
      b_i : [1, f_next_pad]  (f32, zero-padded)
      out : [tm, f_out_pad]  (f32)
    """
    x_ref = refs[0]
    o_ref = refs[-1]
    param_refs = refs[1:-1]

    h = x_ref[...].astype(jnp.float32)
    for i in range(n_layers):
        w = param_refs[2 * i][...]            # bf16
        b = param_refs[2 * i + 1][...]        # f32 [1, f_next_pad]
        # bf16 inputs, f32 accumulation on the MXU.
        y = jnp.dot(h.astype(jnp.bfloat16), w,
                    preferred_element_type=jnp.float32)
        y = y + b.astype(jnp.float32)
        if i != n_layers - 1:
            y = jnp.maximum(y, 0.0)
        h = y

    if has_layernorm:
        gamma = param_refs[2 * n_layers][...].astype(jnp.float32)
        beta = param_refs[2 * n_layers + 1][...].astype(jnp.float32)
        # Statistics over the *valid* features only (lane padding is masked;
        # padded activations are exactly zero by construction).
        col = jax.lax.broadcasted_iota(jnp.int32, h.shape, dimension=1)
        mask = (col < f_out_valid).astype(jnp.float32)
        inv_n = 1.0 / float(f_out_valid)
        mean = jnp.sum(h * mask, axis=-1, keepdims=True) * inv_n
        centered = (h - mean) * mask
        var = jnp.sum(centered * centered, axis=-1, keepdims=True) * inv_n
        h = centered * jax.lax.rsqrt(var + eps) * gamma + beta

    o_ref[...] = h.astype(o_ref.dtype)


# ------------------------------ JAX wrapper ----------------------------------

def mlp_forward(params, x, *, row_tile=256):
    """Run the fused MLP Pallas kernel on x: [N, F_in] -> [N, F_out]."""
    n, f_in = x.shape
    linears = params["linears"]
    n_layers = len(linears)
    f_out = linears[-1][0].shape[1]
    has_ln = params["layernorm"] is not None

    # Lane-dense layout: every feature dim padded to a multiple of 128.
    f_in_pad = _round_up(f_in, 128)
    # Row tile: multiple of 8 sublanes; 256 rows when N is large enough.
    tm = row_tile if n >= row_tile else _round_up(max(n, 8), 8)
    n_pad = _round_up(n, tm)

    x_p = jnp.zeros((n_pad, f_in_pad), x.dtype).at[:n, :f_in].set(x)

    inputs = [x_p]
    in_specs = [pl.BlockSpec((tm, f_in_pad), lambda i: (i, 0))]

    prev_pad = f_in_pad
    for (w, b) in linears:
        fi, fo = w.shape                      # stored transposed: [fin, fout]
        fo_pad = _round_up(fo, 128)
        # bf16 weights (halve HBM/VMEM traffic), zero-padded so padded lanes
        # contribute nothing to the matmul.
        w_p = (jnp.zeros((prev_pad, fo_pad), jnp.float32)
               .at[:fi, :fo].set(w.astype(jnp.float32))
               .astype(jnp.bfloat16))
        b_p = jnp.zeros((1, fo_pad), jnp.float32).at[0, :fo].set(
            b.astype(jnp.float32))
        inputs += [w_p, b_p]
        # Weights/biases resident across all row tiles (loaded once).
        in_specs += [pl.BlockSpec((prev_pad, fo_pad), lambda i: (0, 0)),
                     pl.BlockSpec((1, fo_pad), lambda i: (0, 0))]
        prev_pad = fo_pad
    f_out_pad = prev_pad

    if has_ln:
        gamma, beta = params["layernorm"]
        g_p = jnp.zeros((1, f_out_pad), jnp.float32).at[0, :f_out].set(
            gamma.astype(jnp.float32))
        be_p = jnp.zeros((1, f_out_pad), jnp.float32).at[0, :f_out].set(
            beta.astype(jnp.float32))
        inputs += [g_p, be_p]
        in_specs += [pl.BlockSpec((1, f_out_pad), lambda i: (0, 0)),
                     pl.BlockSpec((1, f_out_pad), lambda i: (0, 0))]

    kernel = functools.partial(
        _mlp_fused_kernel, n_layers=n_layers, f_out_valid=f_out,
        eps=1e-5, has_layernorm=has_ln)

    out = pl.pallas_call(
        kernel,
        out_shape=jax.ShapeDtypeStruct((n_pad, f_out_pad), x.dtype),
        grid=(n_pad // tm,),
        in_specs=in_specs,
        out_specs=pl.BlockSpec((tm, f_out_pad), lambda i: (i, 0)),
        compiler_params=pltpu.CompilerParams(
            dimension_semantics=("parallel",)),
    )(*inputs)
    return out[:n, :f_out]


# ------------------------------- Parameters ----------------------------------

def init_mlp_params(key, input_size, hidden_size, output_size, layers,
                    layernorm=True, dtype=jnp.float32):
    """Matches MLP.reset_parameters: weight ~ N(0, 1/sqrt(in)), bias = 0,
    LayerNorm gamma=1, beta=0. Weights stored transposed as [in, out]."""
    params = {"linears": [], "layernorm": None}
    for i in range(layers):
        fin = input_size if i == 0 else hidden_size
        fout = output_size if i == layers - 1 else hidden_size
        key, sub = jax.random.split(key)
        w = (jax.random.normal(sub, (fin, fout), dtype=jnp.float32)
             * (1.0 / math.sqrt(fin))).astype(dtype)
        b = jnp.zeros((fout,), dtype=dtype)
        params["linears"].append((w, b))
    if layernorm:
        params["layernorm"] = (jnp.ones((output_size,), dtype=dtype),
                               jnp.zeros((output_size,), dtype=dtype))
    return params


def mlp_reference(params, x):
    """Pure-JAX f32 reference."""
    n_lin = len(params["linears"])
    for i, (w, b) in enumerate(params["linears"]):
        x = x @ w + b
        if i != n_lin - 1:
            x = jnp.maximum(x, 0.0)
    if params["layernorm"] is not None:
        gamma, beta = params["layernorm"]
        mean = jnp.mean(x, axis=-1, keepdims=True)
        var = jnp.mean((x - mean) ** 2, axis=-1, keepdims=True)
        x = (x - mean) * jax.lax.rsqrt(var + 1e-5) * gamma + beta
    return x


# ---------------------------------- main --------------------------------------

if __name__ == "__main__":
    key = jax.random.PRNGKey(0)

    # Case 1: small shapes consistent with the module.
    key, kx, kp = jax.random.split(key, 3)
    batch, input_size, hidden_size, output_size, n_layers = 8, 16, 32, 16, 3
    x = jax.random.normal(kx, (batch, input_size), dtype=jnp.float32)
    params = init_mlp_params(kp, input_size, hidden_size, output_size,
                             n_layers, layernorm=True)
    out = jax.block_until_ready(mlp_forward(params, x))
    ref = mlp_reference(params, x)
    assert out.shape == (batch, output_size)
    # bf16 MXU inputs -> looser tolerance vs f32 reference.
    assert jnp.allclose(out, ref, atol=5e-2, rtol=5e-2), "mismatch (case 1)"

    # Case 2: exercises multi-tile row grid + non-divisible N + padded features.
    key, kx2, kp2 = jax.random.split(key, 3)
    b2, in2, hid2, out2, nl2 = 300, 48, 96, 80, 2
    x2 = jax.random.normal(kx2, (b2, in2), dtype=jnp.float32)
    params2 = init_mlp_params(kp2, in2, hid2, out2, nl2, layernorm=True)
    o2 = jax.block_until_ready(mlp_forward(params2, x2))
    r2 = mlp_reference(params2, x2)
    assert o2.shape == (b2, out2)
    assert jnp.allclose(o2, r2, atol=5e-2, rtol=5e-2), "mismatch (case 2)"

    print("KERNEL_OK")
</pallas_src>

<mosaic_0001>
module attributes {stable_mosaic.version = 11 : i64} {
  func.func @_mlp_fused_kernel(%arg0: i32, %arg1: memref<8x128xf32, #tpu.memory_space<vmem>>, %arg2: memref<128x128xbf16, #tpu.memory_space<vmem>>, %arg3: memref<1x128xf32, #tpu.memory_space<vmem>>, %arg4: memref<128x128xbf16, #tpu.memory_space<vmem>>, %arg5: memref<1x128xf32, #tpu.memory_space<vmem>>, %arg6: memref<128x128xbf16, #tpu.memory_space<vmem>>, %arg7: memref<1x128xf32, #tpu.memory_space<vmem>>, %arg8: memref<1x128xf32, #tpu.memory_space<vmem>>, %arg9: memref<1x128xf32, #tpu.memory_space<vmem>>, %arg10: memref<8x128xf32, #tpu.memory_space<vmem>>) attributes {dimension_semantics = [#tpu.dimension_semantics<parallel>], iteration_bounds = array<i64: 1>, scalar_prefetch = 0 : i64, scratch_operands = 0 : i64, tpu.core_type = #tpu.core_type<tc>, window_params = [{transform_indices = @transform_0, window_bounds = array<i64: 8, 128>}, {pipeline_mode = #tpu.pipeline_mode<synchronous>, transform_indices = @transform_1, window_bounds = array<i64: 128, 128>}, {pipeline_mode = #tpu.pipeline_mode<synchronous>, transform_indices = @transform_2, window_bounds = array<i64: 1, 128>}, {pipeline_mode = #tpu.pipeline_mode<synchronous>, transform_indices = @transform_3, window_bounds = array<i64: 128, 128>}, {pipeline_mode = #tpu.pipeline_mode<synchronous>, transform_indices = @transform_4, window_bounds = array<i64: 1, 128>}, {pipeline_mode = #tpu.pipeline_mode<synchronous>, transform_indices = @transform_5, window_bounds = array<i64: 128, 128>}, {pipeline_mode = #tpu.pipeline_mode<synchronous>, transform_indices = @transform_6, window_bounds = array<i64: 1, 128>}, {pipeline_mode = #tpu.pipeline_mode<synchronous>, transform_indices = @transform_7, window_bounds = array<i64: 1, 128>}, {pipeline_mode = #tpu.pipeline_mode<synchronous>, transform_indices = @transform_8, window_bounds = array<i64: 1, 128>}, {transform_indices = @transform_9, window_bounds = array<i64: 8, 128>}]} {
    %c0 = arith.constant 0 : index
    %c0_0 = arith.constant 0 : index
    %0 = vector.load %arg1[%c0, %c0_0] : memref<8x128xf32, #tpu.memory_space<vmem>>, vector<8x128xf32>
    %c0_1 = arith.constant 0 : index
    %c0_2 = arith.constant 0 : index
    %1 = vector.load %arg2[%c0_1, %c0_2] : memref<128x128xbf16, #tpu.memory_space<vmem>>, vector<128x128xbf16>
    %c0_3 = arith.constant 0 : index
    %c0_4 = arith.constant 0 : index
    %2 = vector.load %arg3[%c0_3, %c0_4] : memref<1x128xf32, #tpu.memory_space<vmem>>, vector<1x128xf32>
    %3 = arith.truncf %0 : vector<8x128xf32> to vector<8x128xbf16>
    %cst = arith.constant dense<0.000000e+00> : vector<8x128xf32>
    %4 = tpu.matmul %3, %1, %cst {dimension_numbers = #tpu.dot_dimension_numbers<[1], [0], [0], [1], [0, 0, 1, 1], [], []>} : vector<8x128xbf16>, vector<128x128xbf16>, vector<8x128xf32> -> vector<8x128xf32>
    %5 = vector.broadcast %2 : vector<1x128xf32> to vector<8x128xf32>
    %6 = arith.addf %4, %5 : vector<8x128xf32>
    %cst_5 = arith.constant 0.000000e+00 : f32
    %7 = vector.broadcast %cst_5 : f32 to vector<8x128xf32>
    %8 = arith.maximumf %6, %7 : vector<8x128xf32>
    %c0_6 = arith.constant 0 : index
    %c0_7 = arith.constant 0 : index
    %9 = vector.load %arg4[%c0_6, %c0_7] : memref<128x128xbf16, #tpu.memory_space<vmem>>, vector<128x128xbf16>
    %c0_8 = arith.constant 0 : index
    %c0_9 = arith.constant 0 : index
    %10 = vector.load %arg5[%c0_8, %c0_9] : memref<1x128xf32, #tpu.memory_space<vmem>>, vector<1x128xf32>
    %11 = arith.truncf %8 : vector<8x128xf32> to vector<8x128xbf16>
    %cst_10 = arith.constant dense<0.000000e+00> : vector<8x128xf32>
    %12 = tpu.matmul %11, %9, %cst_10 {dimension_numbers = #tpu.dot_dimension_numbers<[1], [0], [0], [1], [0, 0, 1, 1], [], []>} : vector<8x128xbf16>, vector<128x128xbf16>, vector<8x128xf32> -> vector<8x128xf32>
    %13 = vector.broadcast %10 : vector<1x128xf32> to vector<8x128xf32>
    %14 = arith.addf %12, %13 : vector<8x128xf32>
    %cst_11 = arith.constant 0.000000e+00 : f32
    %15 = vector.broadcast %cst_11 : f32 to vector<8x128xf32>
    %16 = arith.maximumf %14, %15 : vector<8x128xf32>
    %c0_12 = arith.constant 0 : index
    %c0_13 = arith.constant 0 : index
    %17 = vector.load %arg6[%c0_12, %c0_13] : memref<128x128xbf16, #tpu.memory_space<vmem>>, vector<128x128xbf16>
    %c0_14 = arith.constant 0 : index
    %c0_15 = arith.constant 0 : index
    %18 = vector.load %arg7[%c0_14, %c0_15] : memref<1x128xf32, #tpu.memory_space<vmem>>, vector<1x128xf32>
    %19 = arith.truncf %16 : vector<8x128xf32> to vector<8x128xbf16>
    %cst_16 = arith.constant dense<0.000000e+00> : vector<8x128xf32>
    %20 = tpu.matmul %19, %17, %cst_16 {dimension_numbers = #tpu.dot_dimension_numbers<[1], [0], [0], [1], [0, 0, 1, 1], [], []>} : vector<8x128xbf16>, vector<128x128xbf16>, vector<8x128xf32> -> vector<8x128xf32>
    %21 = vector.broadcast %18 : vector<1x128xf32> to vector<8x128xf32>
    %22 = arith.addf %20, %21 : vector<8x128xf32>
    %c0_17 = arith.constant 0 : index
    %c0_18 = arith.constant 0 : index
    %23 = vector.load %arg8[%c0_17, %c0_18] : memref<1x128xf32, #tpu.memory_space<vmem>>, vector<1x128xf32>
    %c0_19 = arith.constant 0 : index
    %c0_20 = arith.constant 0 : index
    %24 = vector.load %arg9[%c0_19, %c0_20] : memref<1x128xf32, #tpu.memory_space<vmem>>, vector<1x128xf32>
    %25 = tpu.iota {dimensions = array<i32: 1>} : vector<8x128xi32>
    %c16_i32 = arith.constant 16 : i32
    %26 = vector.broadcast %c16_i32 : i32 to vector<8x128xi32>
    %27 = arith.cmpi slt, %25, %26 : vector<8x128xi32>
    %28 = arith.extui %27 : vector<8x128xi1> to vector<8x128xi32>
    %29 = arith.sitofp %28 : vector<8x128xi32> to vector<8x128xf32>
    %30 = arith.mulf %22, %29 : vector<8x128xf32>
    %cst_21 = arith.constant dense<0.000000e+00> : vector<8xf32>
    %31 = vector.multi_reduction <add>, %30, %cst_21 [1] : vector<8x128xf32> to vector<8xf32>
    %32 = vector.shape_cast %31 : vector<8xf32> to vector<8x1xf32>
    %cst_22 = arith.constant 6.250000e-02 : f32
    %33 = vector.broadcast %cst_22 : f32 to vector<8x1xf32>
    %34 = arith.mulf %32, %33 : vector<8x1xf32>
    %35 = vector.broadcast %34 : vector<8x1xf32> to vector<8x128xf32>
    %36 = arith.subf %22, %35 : vector<8x128xf32>
    %37 = arith.mulf %36, %29 : vector<8x128xf32>
    %38 = arith.mulf %37, %37 : vector<8x128xf32>
    %cst_23 = arith.constant dense<0.000000e+00> : vector<8xf32>
    %39 = vector.multi_reduction <add>, %38, %cst_23 [1] : vector<8x128xf32> to vector<8xf32>
    %40 = vector.shape_cast %39 : vector<8xf32> to vector<8x1xf32>
    %cst_24 = arith.constant 6.250000e-02 : f32
    %41 = vector.broadcast %cst_24 : f32 to vector<8x1xf32>
    %42 = arith.mulf %40, %41 : vector<8x1xf32>
    %cst_25 = arith.constant 9.99999974E-6 : f32
    %43 = vector.broadcast %cst_25 : f32 to vector<8x1xf32>
    %44 = arith.addf %42, %43 : vector<8x1xf32>
    %45 = math.rsqrt %44 : vector<8x1xf32>
    %46 = vector.broadcast %45 : vector<8x1xf32> to vector<8x128xf32>
    %47 = arith.mulf %37, %46 : vector<8x128xf32>
    %48 = vector.broadcast %23 : vector<1x128xf32> to vector<8x128xf32>
    %49 = arith.mulf %47, %48 : vector<8x128xf32>
    %50 = vector.broadcast %24 : vector<1x128xf32> to vector<8x128xf32>
    %51 = arith.addf %49, %50 : vector<8x128xf32>
    %c0_26 = arith.constant 0 : index
    %c0_27 = arith.constant 0 : index
    %52 = vector.load %arg10[%c0_26, %c0_27] : memref<8x128xf32, #tpu.memory_space<vmem>>, vector<8x128xf32>
    tpu.vector_store %arg10[%c0_26, %c0_27], %51 {strides = array<i32>} : memref<8x128xf32, #tpu.memory_space<vmem>>, vector<8x128xf32>,
    return
  }
  func.func @transform_0(%arg0: i32) -> (i32, i32) {
    %c0_i32 = arith.constant 0 : i32
    %c0_i32_0 = arith.constant 0 : i32
    return %arg0, %c0_i32 : i32, i32
  }
  func.func @transform_1(%arg0: i32) -> (i32, i32) {
    %c0_i32 = arith.constant 0 : i32
    %c0_i32_0 = arith.constant 0 : i32
    %c0_i32_1 = arith.constant 0 : i32
    return %c0_i32, %c0_i32_0 : i32, i32
  }
  func.func @transform_2(%arg0: i32) -> (i32, i32) {
    %c0_i32 = arith.constant 0 : i32
    %c0_i32_0 = arith.constant 0 : i32
    %c0_i32_1 = arith.constant 0 : i32
    return %c0_i32, %c0_i32_0 : i32, i32
  }
  func.func @transform_3(%arg0: i32) -> (i32, i32) {
    %c0_i32 = arith.constant 0 : i32
    %c0_i32_0 = arith.constant 0 : i32
    %c0_i32_1 = arith.constant 0 : i32
    return %c0_i32, %c0_i32_0 : i32, i32
  }
  func.func @transform_4(%arg0: i32) -> (i32, i32) {
    %c0_i32 = arith.constant 0 : i32
    %c0_i32_0 = arith.constant 0 : i32
    %c0_i32_1 = arith.constant 0 : i32
    return %c0_i32, %c0_i32_0 : i32, i32
  }
  func.func @transform_5(%arg0: i32) -> (i32, i32) {
    %c0_i32 = arith.constant 0 : i32
    %c0_i32_0 = arith.constant 0 : i32
    %c0_i32_1 = arith.constant 0 : i32
    return %c0_i32, %c0_i32_0 : i32, i32
  }
  func.func @transform_6(%arg0: i32) -> (i32, i32) {
    %c0_i32 = arith.constant 0 : i32
    %c0_i32_0 = arith.constant 0 : i32
    %c0_i32_1 = arith.constant 0 : i32
    return %c0_i32, %c0_i32_0 : i32, i32
  }
  func.func @transform_7(%arg0: i32) -> (i32, i32) {
    %c0_i32 = arith.constant 0 : i32
    %c0_i32_0 = arith.constant 0 : i32
    %c0_i32_1 = arith.constant 0 : i32
    return %c0_i32, %c0_i32_0 : i32, i32
  }
  func.func @transform_8(%arg0: i32) -> (i32, i32) {
    %c0_i32 = arith.constant 0 : i32
    %c0_i32_0 = arith.constant 0 : i32
    %c0_i32_1 = arith.constant 0 : i32
    return %c0_i32, %c0_i32_0 : i32, i32
  }
  func.func @transform_9(%arg0: i32) -> (i32, i32) {
    %c0_i32 = arith.constant 0 : i32
    %c0_i32_0 = arith.constant 0 : i32
    return %arg0, %c0_i32 : i32, i32
  }
}

</mosaic_0001>

<bundles_post_ra>
// kernel: tpu_custom_call.1
= control target key start
LH: loop header
LB: loop body
LE: loop exit
PB: predicated region body
PF: predicated region fallthrough
CT: control target
= control target key end

     0   :  { %14 = vsyncpa [#allocation3], 0  ;;  %s922_s0 = inlined_call_operand.hbm [shape: f32[8,128], index: 0, kind: input, shape index: {}]   ;;  %s923_s1 = inlined_call_operand.hbm [shape: bf16[128,128], index: 1, kind: input, shape index: {}]   ;;  %s924_s2 = inlined_call_operand.vmem [shape: f32[1,128], index: 2, kind: input, shape index: {}]   ;;  %s925_s3 = inlined_call_operand.hbm [shape: bf16[128,128], index: 3, kind: input, shape index: {}]   ;;  %s926_s4 = inlined_call_operand.vmem [shape: f32[1,128], index: 4, kind: input, shape index: {}]   ;;  %s927_s5 = inlined_call_operand.hbm [shape: bf16[128,128], index: 5, kind: input, shape index: {}]   ;;  %s928_s6 = inlined_call_operand.vmem [shape: f32[1,128], index: 6, kind: input, shape index: {}]   ;;  %s929_s7 = inlined_call_operand.vmem [shape: f32[1,128], index: 7, kind: input, shape index: {}]   ;;  %s930_s8 = inlined_call_operand.vmem [shape: f32[1,128], index: 8, kind: input, shape index: {}]   ;;  %s931_s9 = inlined_call_operand.hbm [shape: f32[8,128], index: 9, kind: output, shape index: {}]  }
   0x1   :  { %15 = vsyncpa [#allocation6], 0 }
   0x2   :  { %16 = vsyncpa [#allocation9], 0 }
   0x3   :  { %17 = vsyncpa [#allocation4], 0  ;;  %s748_s30 = smov [#allocation5]   ;;  %s630_s13 = scalar_lea.hbm %s923_s1, 1024 }
   0x4   :  { %s33_s10 = sshll.u32 %s748_s30, 4  ;;  %p631_p0 = scmp.ne.s32.totalorder %s923_s1, %s630_s13  ;;  %s34_s10 = int_to_ptr.vmem [resolvable:$true] %s33_s10 }
   0x5   :  { %p634_p1 = scmp.lt.u32.totalorder %s630_s13, %s923_s1 }
   0x7   :  { %p636_p2 = pnand %p634_p1, %p631_p0 }
   0x9   :  { %639 = shalt.err (!%p636_p2)
}
   0xa   :  { %s640_s18 = scalar_lea.vmem %s34_s10, 1024  ;;  %p645_p4 = scmp.lt.s32.totalorder %s34_s10, %s34_s10 }
   0xb   :  { %p641_p3 = scmp.ne.s32.totalorder %s34_s10, %s640_s18  ;;  %p646_p5 = scmp.lt.s32.totalorder %s640_s18, %s640_s18 }
   0xd   :  { %p647_p6 = por %p646_p5, %p645_p4 }
   0xf   :  { %p648_p7 = pnand %p647_p6, %p641_p3 }
  0x11   :  { %651 = shalt.err (!%p648_p7)
}
  0x12   :  { %s749_s19 = smov 64   ;;  %s750_s20 = smov 4  }
  0x13   :  { %39 = dma.hbm_to_vmem [thread:$0]  %s923_s1, 1024, %s34_s10, [#allocation6], %s749_s19, %s749_s19, %s750_s20  }
  0x14   :  { %s751_s23 = smov [#allocation2]   ;;  %s752_s25 = smov [#allocation7]  }
  0x15   :  { %s24_s24 = sshll.u32 %s751_s23, 4  ;;  %s47_s26 = sshll.u32 %s752_s25, 4  ;;  %s25_s24 = int_to_ptr.vmem [resolvable:$true] %s24_s24  ;;  %s48_s26 = int_to_ptr.vmem [resolvable:$true] %s47_s26 }
  0x16   :  { %s652_s29 = scalar_lea.hbm %s922_s0, 128 }
  0x17   :  { %p653_p8 = scmp.ne.s32.totalorder %s922_s0, %s652_s29  ;;  %p656_p9 = scmp.lt.u32.totalorder %s652_s29, %s922_s0 }
  0x19   :  { %p658_p10 = pnand %p656_p9, %p653_p8 }
  0x1b   :  { %661 = shalt.err (!%p658_p10)
}
  0x1c   :  { %s662_s1 = scalar_lea.vmem %s25_s24, 128  ;;  %p667_p12 = scmp.lt.s32.totalorder %s25_s24, %s25_s24 }
  0x1d   :  { %p663_p11 = scmp.ne.s32.totalorder %s25_s24, %s662_s1  ;;  %p668_p13 = scmp.lt.s32.totalorder %s662_s1, %s662_s1 }
  0x1f   :  { %p669_p0 = por %p668_p13, %p667_p12 }
  0x21   :  { %p670_p1 = pnand %p669_p0, %p663_p11 }
  0x23   :  { %673 = shalt.err (!%p670_p1)
}
  0x24   :  { %27 = dma.hbm_to_vmem [thread:$0]  %s922_s0, 128, %s25_s24, [#allocation3]  }
  0x25   :  { %s674_s17 = scalar_lea.hbm %s925_s3, 1024 }
  0x26   :  { %p675_p2 = scmp.ne.s32.totalorder %s925_s3, %s674_s17  ;;  %p678_p3 = scmp.lt.u32.totalorder %s674_s17, %s925_s3 }
  0x28   :  { %p680_p4 = pnand %p678_p3, %p675_p2 }
  0x2a   :  { %683 = shalt.err (!%p680_p4)
}
  0x2b   :  { %s684_s25 = scalar_lea.vmem %s48_s26, 1024  ;;  %p689_p6 = scmp.lt.s32.totalorder %s48_s26, %s48_s26 }
  0x2c   :  { %p685_p5 = scmp.ne.s32.totalorder %s48_s26, %s684_s25  ;;  %p690_p7 = scmp.lt.s32.totalorder %s684_s25, %s684_s25 }
  0x2e   :  { %p691_p8 = por %p690_p7, %p689_p6 }
  0x30   :  { %p692_p9 = pnand %p691_p8, %p685_p5 }
  0x32   :  { %695 = shalt.err (!%p692_p9)
}
  0x33   :  { %53 = dma.hbm_to_vmem [thread:$0]  %s925_s3, 1024, %s48_s26, [#allocation6], %s749_s19, %s749_s19, %s750_s20  }
  0x34   :  { %s753_s27 = smov [#allocation8]   ;;  %s696_s11 = scalar_lea.hbm %s927_s5, 1024 }
  0x35   :  { %s61_s28 = sshll.u32 %s753_s27, 4  ;;  %p697_p10 = scmp.ne.s32.totalorder %s927_s5, %s696_s11  ;;  %s62_s28 = int_to_ptr.vmem [resolvable:$true] %s61_s28 }
  0x36   :  { %p700_p11 = scmp.lt.u32.totalorder %s696_s11, %s927_s5 }
  0x38   :  { %p702_p12 = pnand %p700_p11, %p697_p10 }
  0x3a   :  { %705 = shalt.err (!%p702_p12)
}
  0x3b   :  { %s706_s14 = scalar_lea.vmem %s62_s28, 1024  ;;  %p711_p0 = scmp.lt.s32.totalorder %s62_s28, %s62_s28 }
  0x3c   :  { %p707_p13 = scmp.ne.s32.totalorder %s62_s28, %s706_s14  ;;  %p712_p1 = scmp.lt.s32.totalorder %s706_s14, %s706_s14 }
  0x3e   :  { %p713_p2 = por %p712_p1, %p711_p0 }
  0x40   :  { %p714_p3 = pnand %p713_p2, %p707_p13 }
  0x42   :  { %717 = shalt.err (!%p714_p3)
}
  0x43   :  { %67 = dma.hbm_to_vmem [thread:$0]  %s927_s5, 1024, %s62_s28, [#allocation9], %s749_s19, %s749_s19, %s750_s20  }
  0x44   :  { %740 = dma.done.wait [#allocation3], 128  }
  0x45   :  { %741 = vsyncadd [#allocation3], 4294967168 }
  0x46   :  { %742 = dma.done.wait [#allocation6], 2048  }
  0x47   :  { %743 = vsyncadd [#allocation6], 4294965248 }
  0x48   :  { %744 = dma.done.wait [#allocation9], 1024  }
  0x49   :  { %745 = vsyncadd [#allocation9], 4294966272  ;;  %v754_v0 = vmov 0.0   ;;  %vm755_vm0 = vmmov 0   ;;  %v604_v1 = vld [vmem:[#allocation5] sm:$0xff]   ;;  %v605_v2 = vld [vmem:[#allocation5 + $0x8] sm:$0xff]   ;;  %v428_v43 = vlaneseq }
  0x4a   :  { %535 = vmatprep.subr.bf16.mxu0 %v754_v0  ;;  %551 = vmatprep.mubr.msk.bf16.mxu0 %vm755_vm0, %v754_v0  ;;  %v606_v3 = vld [vmem:[#allocation5 + $0x10] sm:$0xff]   ;;  %v612_v4 = vld [vmem:[#allocation7] sm:$0xff]   ;;  %v607_v5 = vld [vmem:[#allocation5 + $0x18] sm:$0xff]   ;;  %s756_s21 = smov [#allocation10]  }
  0x4b   :  { %555 = vmatprep.subr.bf16.mxu1 %v754_v0  ;;  %571 = vmatprep.mubr.msk.bf16.mxu1 %vm755_vm0, %v754_v0  ;;  %v613_v6 = vld [vmem:[#allocation7 + $0x8] sm:$0xff]   ;;  %v608_v7 = vld [vmem:[#allocation5 + $0x20] sm:$0xff]   ;;  %v614_v8 = vld [vmem:[#allocation7 + $0x10] sm:$0xff]   ;;  %v429_v44 = vand.u32 127, %v428_v43  ;;  %s467_s22 = sshll.u32 %s756_s21, 4  ;;  %s468_s22 = int_to_ptr.vmem [resolvable:$true] %s467_s22 }
  0x4c   :  { %536 = vmatpush3.bf16.msra.mxu0 %v604_v1  ;;  %556 = vmatpush3.bf16.msra.mxu1 %v612_v4  ;;  %v609_v9 = vld [vmem:[#allocation5 + $0x28] sm:$0xff]   ;;  %v615_v10 = vld [vmem:[#allocation7 + $0x18] sm:$0xff]   ;;  %v610_v11 = vld [vmem:[#allocation5 + $0x30] sm:$0xff]   ;;  %s718_s23 = scalar_lea.vmem %s468_s22, 128  ;;  %p723_p5 = scmp.lt.s32.totalorder %s468_s22, %s468_s22 }
  0x4d   :  { %537 = vmatprep.subr.bf16.mxu0 %v754_v0  ;;  %557 = vmatprep.subr.bf16.mxu1 %v754_v0  ;;  %v616_v12 = vld [vmem:[#allocation7 + $0x20] sm:$0xff]   ;;  %v611_v13 = vld [vmem:[#allocation5 + $0x38] sm:$0xff]   ;;  %v617_v15 = vld [vmem:[#allocation7 + $0x28] sm:$0xff]   ;;  %vm430_vm1 = vcmp.lt.s32.totalorder %v429_v44, 16  ;;  %p719_p4 = scmp.ne.s32.totalorder %s468_s22, %s718_s23  ;;  %p724_p6 = scmp.lt.s32.totalorder %s718_s23, %s718_s23 }
  0x4e   :  { %v87_v14 = vld [vmem:[#allocation2] sm:$0xff]  ;;  %v618_v17 = vld [vmem:[#allocation7 + $0x30] sm:$0xff]   ;;  %v620_v19 = vld [vmem:[#allocation8] sm:$0xff]   ;;  %v505_v47 = vsel %vm430_vm1, 1.0, %v754_v0 }
  0x4f   :  { %v105_v16 = vpack.c.bf16 %v87_v14, %v87_v14  ;;  %v619_v18 = vld [vmem:[#allocation7 + $0x38] sm:$0xff]   ;;  %v621_v20 = vld [vmem:[#allocation8 + $0x8] sm:$0xff]   ;;  %v622_v21 = vld [vmem:[#allocation8 + $0x10] sm:$0xff]   ;;  %p725_p7 = por %p724_p6, %p723_p5 }
  0x50   :  { %538 = vmatpush3.bf16.msra.mxu0 %v605_v2  ;;  %558 = vmatpush3.bf16.msra.mxu1 %v613_v6  ;;  %v623_v22 = vld [vmem:[#allocation8 + $0x18] sm:$0xff]   ;;  %v624_v23 = vld [vmem:[#allocation8 + $0x20] sm:$0xff]   ;;  %v625_v24 = vld [vmem:[#allocation8 + $0x28] sm:$0xff]  }
  0x51   :  { %539 = vmatprep.subr.bf16.mxu0 %v754_v0  ;;  %559 = vmatprep.subr.bf16.mxu1 %v754_v0  ;;  %v478_v25 = vld [vmem:[%s924_s2] ss:$0 sm:$0xff]  ;;  %v626_v33 = vld [vmem:[#allocation8 + $0x30] sm:$0xff]   ;;  %p726_p8 = pnand %p725_p7, %p719_p4 }
  0x52   :  { %v627_v34 = vld [vmem:[#allocation8 + $0x38] sm:$0xff]  }
  0x53   :  { %v487_v35 = vld [vmem:[%s926_s4] ss:$0 sm:$0xff] }
  0x54   :  { %540 = vmatpush3.bf16.msra.mxu0 %v606_v3  ;;  %560 = vmatpush3.bf16.msra.mxu1 %v614_v8  ;;  %v496_v45 = vld [vmem:[%s928_s6] ss:$0 sm:$0xff] }
  0x55   :  { %541 = vmatprep.subr.bf16.mxu0 %v754_v0  ;;  %561 = vmatprep.subr.bf16.mxu1 %v754_v0  ;;  %v506_v62 = vld [vmem:[%s929_s7] ss:$0 sm:$0xff] }
  0x58   :  { %542 = vmatpush3.bf16.msra.mxu0 %v607_v5  ;;  %562 = vmatpush3.bf16.msra.mxu1 %v615_v10 }
  0x59   :  { %543 = vmatprep.subr.bf16.mxu0 %v754_v0  ;;  %563 = vmatprep.subr.bf16.mxu1 %v754_v0 }
  0x5c   :  { %544 = vmatpush3.bf16.msra.mxu0 %v608_v7  ;;  %564 = vmatpush3.bf16.msra.mxu1 %v616_v12 }
  0x5d   :  { %545 = vmatprep.subr.bf16.mxu0 %v754_v0  ;;  %565 = vmatprep.subr.bf16.mxu1 %v754_v0 }
  0x60   :  { %546 = vmatpush3.bf16.msra.mxu0 %v609_v9  ;;  %566 = vmatpush3.bf16.msra.mxu1 %v617_v15 }
  0x61   :  { %547 = vmatprep.subr.bf16.mxu0 %v754_v0  ;;  %567 = vmatprep.subr.bf16.mxu1 %v754_v0 }
  0x64   :  { %548 = vmatpush3.bf16.msra.mxu0 %v610_v11  ;;  %568 = vmatpush3.bf16.msra.mxu1 %v618_v17 }
  0x65   :  { %549 = vmatprep.subr.bf16.mxu0 %v754_v0  ;;  %569 = vmatprep.subr.bf16.mxu1 %v754_v0 }
  0x68   :  { %550 = vmatpush3.bf16.msra.mxu0 %v611_v13  ;;  %570 = vmatpush3.bf16.msra.mxu1 %v619_v18 }
  0x69   :  { %575 = vmatprep.subr.bf16.mxu0 %v754_v0 }
  0x6b   :  { %552 = vmatmul.mubr.bf16.vlgmr.msra.gmra.mrb[0].mxu0 %v105_v16 }
  0x6c   :  { %591 = vmatprep.mubr.msk.bf16.mxu0 %vm755_vm0, %v754_v0  ;;  %576 = vmatpush3.bf16.msra.mxu0 %v620_v19 }
  0x6d   :  { %577 = vmatprep.subr.bf16.mxu0 %v754_v0 }
  0x70   :  { %578 = vmatpush3.bf16.msra.mxu0 %v621_v20 }
  0x71   :  { %579 = vmatprep.subr.bf16.mxu0 %v754_v0 }
  0x74   :  { %580 = vmatpush3.bf16.msra.mxu0 %v622_v21 }
  0x75   :  { %581 = vmatprep.subr.bf16.mxu0 %v754_v0 }
  0x78   :  { %582 = vmatpush3.bf16.msra.mxu0 %v623_v22 }
  0x79   :  { %583 = vmatprep.subr.bf16.mxu0 %v754_v0 }
  0x7c   :  { %584 = vmatpush3.bf16.msra.mxu0 %v624_v23 }
  0x7d   :  { %585 = vmatprep.subr.bf16.mxu0 %v754_v0 }
  0x80   :  { %586 = vmatpush3.bf16.msra.mxu0 %v625_v24 }
  0x81   :  { %587 = vmatprep.subr.bf16.mxu0 %v754_v0 }
  0x84   :  { %588 = vmatpush3.bf16.msra.mxu0 %v626_v33 }
  0x85   :  { %589 = vmatprep.subr.bf16.mxu0 %v754_v0  ;;  %v507_v0 = vld [vmem:[%s930_s8] ss:$0 sm:$0xff] }
  0x88   :  { %590 = vmatpush3.bf16.msra.mxu0 %v627_v34 }
 0x13e   :  { %v194_v26 = vpop.f32.mrb[0].mxu0 }
 0x13f   :  { %v195_v27 = vadd.f32 %v478_v25, %v194_v26  ;;  %v553_v28 = vpop.f32.mrb[1].mxu0 }
 0x140   :  { %v197_v29 = vpop.f32.mrb[2].mxu0 }
 0x141   :  { %v200_v30 = vmax.f32 %v195_v27, 0.0  ;;  %v554_v31 = vpop.f32.mrb[3].mxu0 }
 0x143   :  { %v218_v32 = vpack.c.bf16 %v200_v30, %v200_v30 }
 0x145   :  { %572 = vmatmul.mubr.bf16.vlgmr.msra.gmra.mrb[0].mxu1 %v218_v32 }
 0x218   :  { %v307_v36 = vpop.f32.mrb[0].mxu1 }
 0x219   :  { %v308_v37 = vadd.f32 %v487_v35, %v307_v36  ;;  %v573_v38 = vpop.f32.mrb[1].mxu1 }
 0x21a   :  { %v310_v39 = vpop.f32.mrb[2].mxu1 }
 0x21b   :  { %v313_v40 = vmax.f32 %v308_v37, 0.0  ;;  %v574_v41 = vpop.f32.mrb[3].mxu1 }
 0x21d   :  { %v331_v42 = vpack.c.bf16 %v313_v40, %v313_v40 }
 0x21f   :  { %592 = vmatmul.mubr.bf16.vlgmr.msra.gmra.mrb[4].mxu0 %v331_v42 }
 0x2f2   :  { %v420_v46 = vpop.f32.mrb[4].mxu0 }
 0x2f3   :  { %v421_v48 = vadd.f32 %v496_v45, %v420_v46  ;;  %v593_v49 = vpop.f32.mrb[5].mxu0 }
 0x2f4   :  { %v423_v50 = vpop.f32.mrb[6].mxu0 }
 0x2f5   :  { %v594_v51 = vpop.f32.mrb[7].mxu0  ;;  %v433_v52 = vmul.f32 %v505_v47, %v421_v48 }
 0x2f7   :  { %434 = vadd.xlane.f32.xlu0 %v433_v52 }
 0x384   :  { %v435_v53 = vpop.xlane.xlu0 %434 }
 0x385   :  { %v436_v54 = vmul.f32 0.0625, %v435_v53 }
 0x387   :  { %v437_v55 = vsub.f32 %v421_v48, %v436_v54 }
 0x389   :  { %v438_v56 = vmul.f32 %v505_v47, %v437_v55 }
 0x38b   :  { %v439_v57 = vmul.f32 %v438_v56, %v438_v56 }
 0x38d   :  { %440 = vadd.xlane.f32.xlu0 %v439_v57 }
 0x41a   :  { %v441_v58 = vpop.xlane.xlu0 %440 }
 0x41b   :  { %v442_v59 = vmul.f32 0.0625, %v441_v58 }
 0x41d   :  { %v443_v60 = vadd.f32 1e-05, %v442_v59 }
 0x41f   :  { %628 = vrsqrt.f32 %v443_v60 }
 0x429   :  { %v629_v61 = vpop.eup %628 }
 0x42a   :  { %v445_v63 = vmul.f32 %v629_v61, %v438_v56 }
 0x42c   :  { %v452_v1 = vmul.f32 %v506_v62, %v445_v63 }
 0x42e   :  { %v459_v2 = vadd.f32 %v507_v0, %v452_v1 }
 0x430   :  { %460 = vst [vmem:[#allocation10] sm:$0xff] %v459_v2 }
 0x431   :  { %729 = shalt.err (!%p726_p8)
}
 0x432   :  { %s730_s0 = scalar_lea.hbm %s931_s9, 128 }
 0x433   :  { %p731_p9 = scmp.ne.s32.totalorder %s931_s9, %s730_s0  ;;  %p734_p10 = scmp.lt.u32.totalorder %s730_s0, %s931_s9 }
 0x435   :  { %p736_p11 = pnand %p734_p10, %p731_p9 }
 0x437   :  { %739 = shalt.err (!%p736_p11)
}
 0x438   :  { %470 = dma.vmem_to_hbm [thread:$0]  %s468_s22, 128, %s931_s9, [#allocation4]  }
 0x439   :  { %746 = dma.done.wait [#allocation4], 128  }
 0x43a   :  { %747 = vsyncadd [#allocation4], 4294967168 }
 0x43b   :  { %474 = vsyncpa [#allocation3], 1 }
 0x43c   :  { %475 = vsyncpa [#allocation6], 1 }
 0x43d   :  { %476 = vsyncpa [#allocation9], 1 }
 0x43e   :  { %477 = vsyncpa [#allocation4], 1 }

</bundles_post_ra>
